<compile_context>
chip_gen: v6e
topology: v6e:2x2x1
jax: 0.10.0
libtpu: 0.0.40
codegen_flags: <defaults>
</compile_context>

<pallas_src>
import functools

import jax
import jax.numpy as jnp
from jax.experimental import pallas as pl
from jax.experimental.pallas import tpu as pltpu


# ----------------------------------------------------------------------------
# Shared gate math (runs inside the kernels).
# Weights/bias already carry the 0.5 pre-scale on the i/f/o column blocks, so
# sigmoid(z) == 0.5 * tanh(pre) + 0.5 below.  Gate order matches nn.LSTMCell:
# [i, f, g, o] along the 4H axis.
# ----------------------------------------------------------------------------
def _lstm_gate_math(x, h, c, wih, whh, bias, hidden_size):
    H = hidden_size
    pre = (
        jnp.dot(x, wih, preferred_element_type=jnp.float32)
        + jnp.dot(h, whh, preferred_element_type=jnp.float32)
        + bias
    )
    t = jnp.tanh(pre)                        # one full-width EUP push for all 4 gates
    i_g = 0.5 * t[:, 0 * H:1 * H] + 0.5
    f_g = 0.5 * t[:, 1 * H:2 * H] + 0.5
    g_g = t[:, 2 * H:3 * H]
    o_g = 0.5 * t[:, 3 * H:4 * H] + 0.5
    c_new = f_g * c + i_g * g_g
    h_new = o_g * jnp.tanh(c_new)
    return h_new, c_new


# ----------------------------------------------------------------------------
# Single-step kernel (matches Predictor.forward semantics).
# State is packed as (2, B, H): [0] = h, [1] = c, and aliased in place.
# ----------------------------------------------------------------------------
def _lstm_step_kernel(x_ref, hc_ref, wih_ref, whh_ref, b_ref, hc_out_ref, *,
                      hidden_size):
    wdt = wih_ref.dtype
    x = x_ref[...].astype(wdt)
    h = hc_ref[0].astype(wdt)
    c = hc_ref[1].astype(jnp.float32)
    h_new, c_new = _lstm_gate_math(
        x, h, c, wih_ref[...], whh_ref[...], b_ref[...], hidden_size)
    hc_out_ref[0] = h_new.astype(hc_out_ref.dtype)
    hc_out_ref[1] = c_new.astype(hc_out_ref.dtype)


@jax.jit
def lstm_cell_step(x, hc, wih_t, whh_t, bias):
    """One LSTMCell step. x: (B, I), hc: (2, B, H). Returns new hc (2, B, H)."""
    B, I = x.shape
    H = hc.shape[-1]
    bias_b = jnp.broadcast_to(bias, (B, 4 * H))   # broadcast once, outside the kernel

    kernel = functools.partial(_lstm_step_kernel, hidden_size=H)
    full = lambda shape: pl.BlockSpec(shape, lambda: (0,) * len(shape))

    hc_new = pl.pallas_call(
        kernel,
        out_shape=jax.ShapeDtypeStruct((2, B, H), jnp.float32),
        grid=(),
        in_specs=[
            full((B, I)),
            full((2, B, H)),
            full((I, 4 * H)),
            full((H, 4 * H)),
            full((B, 4 * H)),
        ],
        out_specs=full((2, B, H)),
        input_output_aliases={1: 0},              # update hc in place
    )(x, hc, wih_t, whh_t, bias_b)
    return hc_new


# ----------------------------------------------------------------------------
# Fused multi-step rollout kernel: the whole recurrence in one pallas_call.
# ----------------------------------------------------------------------------
def _lstm_rollout_kernel(x_ref, hc0_ref, wih_ref, whh_ref, b_ref,
                         hc_seq_ref, state_ref, *, hidden_size):
    @pl.when(pl.program_id(0) == 0)
    def _():
        state_ref[...] = hc0_ref[...]

    wdt = wih_ref.dtype
    x = x_ref[...].astype(wdt)
    h = state_ref[0].astype(wdt)
    c = state_ref[1]
    h_new, c_new = _lstm_gate_math(
        x, h, c, wih_ref[...], whh_ref[...], b_ref[...], hidden_size)
    state_ref[0] = h_new
    state_ref[1] = c_new
    hc_seq_ref[0] = h_new.astype(hc_seq_ref.dtype)
    hc_seq_ref[1] = c_new.astype(hc_seq_ref.dtype)


@jax.jit
def lstm_rollout(actions, hc0, wih_t, whh_t, bias):
    """Run the LSTMCell over a (T, B, I) action sequence in one pallas_call.

    Returns (h_seq (T, B, H), hc_final (2, B, H)).
    """
    T, B, I = actions.shape
    H = hc0.shape[-1]
    bias_b = jnp.broadcast_to(bias, (B, 4 * H))   # hoisted out of the time loop

    kernel = functools.partial(_lstm_rollout_kernel, hidden_size=H)
    const = lambda shape: pl.BlockSpec(shape, lambda t: (0,) * len(shape))

    # Everything here is tiny relative to VMEM (even v7x's 64 MiB); weights,
    # bias and initial state stay resident, only the per-step action streams.
    hc_seq = pl.pallas_call(
        kernel,
        out_shape=jax.ShapeDtypeStruct((T, 2, B, H), jnp.float32),
        grid=(T,),
        in_specs=[
            pl.BlockSpec((None, B, I), lambda t: (t, 0, 0)),   # action[t]
            const((2, B, H)),        # initial state (read only at t == 0)
            const((I, 4 * H)),       # W_ih^T (pre-scaled), resident
            const((H, 4 * H)),       # W_hh^T (pre-scaled), resident
            const((B, 4 * H)),       # bias (pre-summed/scaled/broadcast), resident
        ],
        out_specs=pl.BlockSpec((None, 2, B, H), lambda t: (t, 0, 0, 0)),
        scratch_shapes=[pltpu.VMEM((2, B, H), jnp.float32)],   # carried h/c
        compiler_params=pltpu.CompilerParams(
            dimension_semantics=("arbitrary",)),
    )(actions, hc0, wih_t, whh_t, bias_b)

    h_seq = hc_seq[:, 0]
    hc_final = hc_seq[-1]
    return h_seq, hc_final


# ----------------------------------------------------------------------------
# JAX/Pallas equivalent of the PyTorch Predictor module.
# ----------------------------------------------------------------------------
class Predictor:

    def __init__(self, input_size, hidden_size, key, param_dtype=jnp.float32):
        self.input_size = input_size
        self.hidden_size = hidden_size
        k1, k2, k3, k4 = jax.random.split(key, 4)
        bound = 1.0 / (hidden_size ** 0.5)
        # Raw parameters: same shapes/init scheme as nn.LSTMCell ([i,f,g,o] rows).
        self.w_ih = jax.random.uniform(k1, (4 * hidden_size, input_size),
                                       jnp.float32, -bound, bound)
        self.w_hh = jax.random.uniform(k2, (4 * hidden_size, hidden_size),
                                       jnp.float32, -bound, bound)
        self.b_ih = jax.random.uniform(k3, (4 * hidden_size,),
                                       jnp.float32, -bound, bound)
        self.b_hh = jax.random.uniform(k4, (4 * hidden_size,),
                                       jnp.float32, -bound, bound)

        # Kernel-ready parameters (hoisted out of forward):
        #   transposed to (K, 4H); i/f/o column blocks pre-scaled by 0.5 so the
        #   kernel can use a single tanh for all gates; biases pre-summed.
        # Set param_dtype=jnp.bfloat16 on v6e/v7x for native-bf16 MXU weights
        # (f32 accumulation is kept regardless).
        H = hidden_size
        gate_scale = jnp.concatenate(
            [jnp.full((1, H), 0.5, jnp.float32),
             jnp.full((1, H), 0.5, jnp.float32),
             jnp.ones((1, H), jnp.float32),
             jnp.full((1, H), 0.5, jnp.float32)], axis=1)              # (1, 4H)
        self.wih_t = (self.w_ih.T * gate_scale).astype(param_dtype)    # (I, 4H)
        self.whh_t = (self.w_hh.T * gate_scale).astype(param_dtype)    # (H, 4H)
        self.bias = ((self.b_ih + self.b_hh).reshape(1, 4 * H)
                     * gate_scale).astype(jnp.float32)                 # (1, 4H)

        self.hc = None   # packed state (2, B, H): [0] = h, [1] = c

    # --- state accessors (API parity with the PyTorch module) ---------------
    @property
    def h(self):
        return None if self.hc is None else self.hc[0]

    @property
    def c(self):
        return None if self.hc is None else self.hc[1]

    def set_hc(self, h, c):
        self.hc = jnp.stack([h.astype(jnp.float32), c.astype(jnp.float32)], axis=0)

    def reset_hc(self):
        self.hc = jnp.zeros_like(self.hc)

    # --- forward -------------------------------------------------------------
    def forward(self, action):
        """Single LSTMCell step (same semantics as the PyTorch forward)."""
        self.hc = lstm_cell_step(action, self.hc, self.wih_t, self.whh_t, self.bias)
        return self.hc[0]

    def rollout(self, actions):
        """Fused multi-step forward over actions (T, B, I); returns h per step."""
        h_seq, self.hc = lstm_rollout(actions, self.hc,
                                      self.wih_t, self.whh_t, self.bias)
        return h_seq


# ----------------------------------------------------------------------------
# Pure-JAX reference of the PyTorch nn.LSTMCell semantics (for checking).
# ----------------------------------------------------------------------------
def _reference_lstm_cell(x, h, c, w_ih, w_hh, b_ih, b_hh):
    gates = x @ w_ih.T + b_ih + h @ w_hh.T + b_hh
    H = h.shape[1]
    i = jax.nn.sigmoid(gates[:, :H])
    f = jax.nn.sigmoid(gates[:, H:2 * H])
    g = jnp.tanh(gates[:, 2 * H:3 * H])
    o = jax.nn.sigmoid(gates[:, 3 * H:])
    c_new = f * c + i * g
    h_new = o * jnp.tanh(c_new)
    return h_new, c_new


if __name__ == "__main__":
    key = jax.random.PRNGKey(0)
    k_param, k_x, k_h, k_c, k_seq = jax.random.split(key, 5)

    batch, input_size, hidden_size, steps = 8, 16, 32, 6

    model = Predictor(input_size, hidden_size, k_param)
    action = jax.random.normal(k_x, (batch, input_size), jnp.float32)
    h0 = jax.random.normal(k_h, (batch, hidden_size), jnp.float32)
    c0 = jax.random.normal(k_c, (batch, hidden_size), jnp.float32)

    # ---- single-step forward (PyTorch-equivalent semantics) ----------------
    model.set_hc(h0, c0)
    h_out = model.forward(action)
    jax.block_until_ready(h_out)

    h_ref, c_ref = _reference_lstm_cell(
        action, h0, c0, model.w_ih, model.w_hh, model.b_ih, model.b_hh)
    assert jnp.allclose(h_out, h_ref, atol=1e-5, rtol=1e-5)
    assert jnp.allclose(model.c, c_ref, atol=1e-5, rtol=1e-5)

    # ---- fused multi-step rollout (one pallas_call for the recurrence) -----
    actions = jax.random.normal(k_seq, (steps, batch, input_size), jnp.float32)
    model.set_hc(h0, c0)
    h_seq = model.rollout(actions)
    jax.block_until_ready(h_seq)

    h_r, c_r = h0, c0
    h_list = []
    for t in range(steps):
        h_r, c_r = _reference_lstm_cell(
            actions[t], h_r, c_r, model.w_ih, model.w_hh, model.b_ih, model.b_hh)
        h_list.append(h_r)
    h_seq_ref = jnp.stack(h_list, axis=0)
    assert jnp.allclose(h_seq, h_seq_ref, atol=1e-4, rtol=1e-4)
    assert jnp.allclose(model.h, h_r, atol=1e-4, rtol=1e-4)
    assert jnp.allclose(model.c, c_r, atol=1e-4, rtol=1e-4)

    print("KERNEL_OK")
</pallas_src>

<mosaic_0001>
module attributes {stable_mosaic.version = 11 : i64} {
  func.func @_lstm_step_kernel(%arg0: memref<8x16xf32, #tpu.memory_space<vmem>>, %arg1: memref<2x8x32xf32, #tpu.memory_space<vmem>>, %arg2: memref<16x128xf32, #tpu.memory_space<vmem>>, %arg3: memref<32x128xf32, #tpu.memory_space<vmem>>, %arg4: memref<8x128xf32, #tpu.memory_space<vmem>>, %arg5: memref<2x8x32xf32, #tpu.memory_space<vmem>>) attributes {dimension_semantics = [], scalar_prefetch = 0 : i64, scratch_operands = 0 : i64, tpu.core_type = #tpu.core_type<tc>} {
    %c0 = arith.constant 0 : index
    %c0_0 = arith.constant 0 : index
    %0 = vector.load %arg0[%c0, %c0_0] : memref<8x16xf32, #tpu.memory_space<vmem>>, vector<8x16xf32>
    %c0_1 = arith.constant 0 : index
    %c0_2 = arith.constant 0 : index
    %c0_3 = arith.constant 0 : index
    %1 = vector.load %arg1[%c0_1, %c0_2, %c0_3] : memref<2x8x32xf32, #tpu.memory_space<vmem>>, vector<1x8x32xf32>
    %2 = vector.shape_cast %1 : vector<1x8x32xf32> to vector<8x32xf32>
    %c1 = arith.constant 1 : index
    %c0_4 = arith.constant 0 : index
    %c0_5 = arith.constant 0 : index
    %3 = vector.load %arg1[%c1, %c0_4, %c0_5] : memref<2x8x32xf32, #tpu.memory_space<vmem>>, vector<1x8x32xf32>
    %4 = vector.shape_cast %3 : vector<1x8x32xf32> to vector<8x32xf32>
    %c0_6 = arith.constant 0 : index
    %c0_7 = arith.constant 0 : index
    %5 = vector.load %arg2[%c0_6, %c0_7] : memref<16x128xf32, #tpu.memory_space<vmem>>, vector<16x128xf32>
    %c0_8 = arith.constant 0 : index
    %c0_9 = arith.constant 0 : index
    %6 = vector.load %arg3[%c0_8, %c0_9] : memref<32x128xf32, #tpu.memory_space<vmem>>, vector<32x128xf32>
    %c0_10 = arith.constant 0 : index
    %c0_11 = arith.constant 0 : index
    %7 = vector.load %arg4[%c0_10, %c0_11] : memref<8x128xf32, #tpu.memory_space<vmem>>, vector<8x128xf32>
    %cst = arith.constant dense<0.000000e+00> : vector<8x128xf32>
    %8 = tpu.matmul %0, %5, %cst {dimension_numbers = #tpu.dot_dimension_numbers<[1], [0], [0], [1], [0, 0, 1, 1], [], []>} : vector<8x16xf32>, vector<16x128xf32>, vector<8x128xf32> -> vector<8x128xf32>
    %cst_12 = arith.constant dense<0.000000e+00> : vector<8x128xf32>
    %9 = tpu.matmul %2, %6, %cst_12 {dimension_numbers = #tpu.dot_dimension_numbers<[1], [0], [0], [1], [0, 0, 1, 1], [], []>} : vector<8x32xf32>, vector<32x128xf32>, vector<8x128xf32> -> vector<8x128xf32>
    %10 = arith.addf %8, %9 : vector<8x128xf32>
    %11 = arith.addf %10, %7 : vector<8x128xf32>
    %12 = math.tanh %11 : vector<8x128xf32>
    %13 = vector.extract_strided_slice %12 {offsets = [0, 0], sizes = [8, 32], strides = [1, 1]} : vector<8x128xf32> to vector<8x32xf32>
    %cst_13 = arith.constant 5.000000e-01 : f32
    %14 = vector.broadcast %cst_13 : f32 to vector<8x32xf32>
    %15 = arith.mulf %14, %13 : vector<8x32xf32>
    %cst_14 = arith.constant 5.000000e-01 : f32
    %16 = vector.broadcast %cst_14 : f32 to vector<8x32xf32>
    %17 = arith.addf %15, %16 : vector<8x32xf32>
    %18 = vector.extract_strided_slice %12 {offsets = [0, 32], sizes = [8, 32], strides = [1, 1]} : vector<8x128xf32> to vector<8x32xf32>
    %cst_15 = arith.constant 5.000000e-01 : f32
    %19 = vector.broadcast %cst_15 : f32 to vector<8x32xf32>
    %20 = arith.mulf %19, %18 : vector<8x32xf32>
    %cst_16 = arith.constant 5.000000e-01 : f32
    %21 = vector.broadcast %cst_16 : f32 to vector<8x32xf32>
    %22 = arith.addf %20, %21 : vector<8x32xf32>
    %23 = vector.extract_strided_slice %12 {offsets = [0, 64], sizes = [8, 32], strides = [1, 1]} : vector<8x128xf32> to vector<8x32xf32>
    %24 = vector.extract_strided_slice %12 {offsets = [0, 96], sizes = [8, 32], strides = [1, 1]} : vector<8x128xf32> to vector<8x32xf32>
    %cst_17 = arith.constant 5.000000e-01 : f32
    %25 = vector.broadcast %cst_17 : f32 to vector<8x32xf32>
    %26 = arith.mulf %25, %24 : vector<8x32xf32>
    %cst_18 = arith.constant 5.000000e-01 : f32
    %27 = vector.broadcast %cst_18 : f32 to vector<8x32xf32>
    %28 = arith.addf %26, %27 : vector<8x32xf32>
    %29 = arith.mulf %22, %4 : vector<8x32xf32>
    %30 = arith.mulf %17, %23 : vector<8x32xf32>
    %31 = arith.addf %29, %30 : vector<8x32xf32>
    %32 = math.tanh %31 : vector<8x32xf32>
    %33 = arith.mulf %28, %32 : vector<8x32xf32>
    %c0_19 = arith.constant 0 : index
    %c0_20 = arith.constant 0 : index
    %c0_21 = arith.constant 0 : index
    %34 = vector.load %arg5[%c0_19, %c0_20, %c0_21] : memref<2x8x32xf32, #tpu.memory_space<vmem>>, vector<1x8x32xf32>
    %35 = vector.shape_cast %34 : vector<1x8x32xf32> to vector<8x32xf32>
    %36 = vector.shape_cast %33 : vector<8x32xf32> to vector<1x8x32xf32>
    tpu.vector_store %arg5[%c0_19, %c0_20, %c0_21], %36 {strides = array<i32>} : memref<2x8x32xf32, #tpu.memory_space<vmem>>, vector<1x8x32xf32>,
    %c1_22 = arith.constant 1 : index
    %c0_23 = arith.constant 0 : index
    %c0_24 = arith.constant 0 : index
    %37 = vector.load %arg5[%c1_22, %c0_23, %c0_24] : memref<2x8x32xf32, #tpu.memory_space<vmem>>, vector<1x8x32xf32>
    %38 = vector.shape_cast %37 : vector<1x8x32xf32> to vector<8x32xf32>
    %39 = vector.shape_cast %31 : vector<8x32xf32> to vector<1x8x32xf32>
    tpu.vector_store %arg5[%c1_22, %c0_23, %c0_24], %39 {strides = array<i32>} : memref<2x8x32xf32, #tpu.memory_space<vmem>>, vector<1x8x32xf32>,
    return
  }
}

</mosaic_0001>

<bundles_post_ra>
// kernel: lstm_cell_step.1
= control target key start
LH: loop header
LB: loop body
LE: loop exit
PB: predicated region body
PF: predicated region fallthrough
CT: control target
= control target key end

     0   :  { %10 = vsyncpa [#allocation3], 0  ;;  %s449_s0 = inlined_call_operand.vmem [shape: f32[8,16], index: 0, kind: input, shape index: {}]   ;;  %s450_s1 = inlined_call_operand.hbm [shape: f32[2,8,32], index: 1, kind: input, shape index: {}, may-alias: {1,5}]   ;;  %s451_s2 = inlined_call_operand.hbm [shape: f32[16,128], index: 2, kind: input, shape index: {}]   ;;  %s452_s3 = inlined_call_operand.vmem [shape: f32[32,128], index: 3, kind: input, shape index: {}]   ;;  %s453_s4 = inlined_call_operand.vmem [shape: f32[8,128], index: 4, kind: input, shape index: {}]   ;;  %s454_s5 = inlined_call_operand.hbm [shape: f32[2,8,32], index: 5, kind: output, shape index: {}, may-alias: {1,5}]  }
   0x1   :  { %11 = vsyncpa [#allocation6], 0 }
   0x2   :  { %12 = vsyncpa [#allocation4], 0  ;;  %s370_s18 = smov [#allocation2]  }
   0x3   :  { %s20_s19 = sshll.u32 %s370_s18, 4  ;;  %s21_s19 = int_to_ptr.vmem [resolvable:$true] %s20_s19 }
   0x4   :  { %s312_s20 = scalar_lea.vmem %s21_s19, 256  ;;  %p317_p1 = scmp.lt.s32.totalorder %s21_s19, %s21_s19 }
   0x5   :  { %p313_p0 = scmp.ne.s32.totalorder %s21_s19, %s312_s20  ;;  %p318_p2 = scmp.lt.s32.totalorder %s312_s20, %s312_s20 }
   0x7   :  { %p319_p3 = por %p318_p2, %p317_p1 }
   0x9   :  { %p320_p4 = pnand %p319_p3, %p313_p0 }
   0xb   :  { %323 = shalt.err (!%p320_p4)
}
   0xc   :  { %s371_s21 = smov 128   ;;  %s372_s22 = smov 8  }
   0xd   :  { %26 = dma.hbm_to_vmem [thread:$0]  %s450_s1, 256, %s21_s19, [#allocation3], %s371_s21, %s371_s21, %s372_s22  }
   0xe   :  { %s373_s25 = smov [#allocation5]  }
   0xf   :  { %s32_s26 = sshll.u32 %s373_s25, 4  ;;  %s33_s26 = int_to_ptr.vmem [resolvable:$true] %s32_s26 }
  0x10   :  { %s332_s27 = scalar_lea.vmem %s33_s26, 256  ;;  %p337_p6 = scmp.lt.s32.totalorder %s33_s26, %s33_s26 }
  0x11   :  { %p333_p5 = scmp.ne.s32.totalorder %s33_s26, %s332_s27  ;;  %p338_p7 = scmp.lt.s32.totalorder %s332_s27, %s332_s27 }
  0x13   :  { %p339_p8 = por %p338_p7, %p337_p6 }
  0x15   :  { %p340_p9 = pnand %p339_p8, %p333_p5 }
  0x17   :  { %343 = shalt.err (!%p340_p9)
}
  0x18   :  { %38 = dma.hbm_to_vmem [thread:$0]  %s451_s2, 256, %s33_s26, [#allocation6], %s371_s21, %s371_s21, %s372_s22  }
  0x19   :  { %364 = dma.done.wait [#allocation3], 256  }
  0x1a   :  { %365 = vsyncadd [#allocation3], 4294967040 }
  0x1b   :  { %366 = dma.done.wait [#allocation6], 256  }
  0x1c   :  { %367 = vsyncadd [#allocation6], 4294967040  ;;  %v374_v0 = vmov 0.0   ;;  %vm375_vm0 = vmmov 0   ;;  %v58_v1 = vld [vmem:[%s452_s3 + $0x18] sm:$0xff]  ;;  %v57_v2 = vld [vmem:[%s452_s3 + $0x10] sm:$0xff] }
  0x1d   :  { %272 = vmatprep.subr.mxu0 %v374_v0  ;;  %283 = vmatprep.subr.mxu1 %v374_v0  ;;  %v54_v3 = vld [vmem:[#allocation5 + $0x8] sm:$0xff]  ;;  %v53_v4 = vld [vmem:[#allocation5] sm:$0xff]  ;;  %v49_v5 = vld [vmem:[%s449_s0] sm:$0xff]  ;;  %vm134_vm1 = vcmask 130048   ;;  %vm60_vm2 = vcmask 261120   ;;  %s377_s14 = smov 32  }
  0x1e   :  { %287 = vmatprep.mubr.msk.f32.mxu1 %vm375_vm0, %v374_v0  ;;  %280 = vmatprep.mubr.msk.f32.mxu0 %vm375_vm0, %v374_v0  ;;  %v56_v6 = vld [vmem:[%s452_s3 + $0x8] sm:$0xff]  ;;  %v55_v7 = vld [vmem:[%s452_s3] sm:$0xff]  ;;  %s376_s3 = smov 64   ;;  %s379_s15 = smov [#allocation7]  }
  0x1f   :  { %273 = vmatpush3.msra.mxu0 %v58_v1  ;;  %284 = vmatpush3.msra.mxu1 %v54_v3  ;;  %v50_v8 = vld [vmem:[#allocation2] sm:$0xff]  ;;  %v52_v17 = vld [vmem:[#allocation2 + $0x8] sm:$0xff]  ;;  %s249_s16 = sshll.u32 %s379_s15, 4  ;;  %s250_s16 = int_to_ptr.vmem [resolvable:$true] %s249_s16 }
  0x20   :  { %274 = vmatprep.subr.mxu0 %v374_v0  ;;  %285 = vmatprep.subr.mxu1 %v374_v0  ;;  %v59_v11 = vld [vmem:[%s453_s4] sm:$0xff]  ;;  %s378_s4 = smov 96   ;;  %s344_s17 = scalar_lea.vmem %s250_s16, 256 }
  0x21   :  { %275 = vmatpush3.msra.mxu0 %v57_v2  ;;  %286 = vmatpush3.msra.mxu1 %v53_v4  ;;  %p345_p10 = scmp.ne.s32.totalorder %s250_s16, %s344_s17  ;;  %p349_p11 = scmp.lt.s32.totalorder %s250_s16, %s250_s16 }
  0x22   :  { %276 = vmatprep.subr.mxu0 %v374_v0  ;;  %288 = vmatmul.mubr.msk.f32.vlgmr.msra.gmra.mxu1 %vm134_vm1, %v49_v5  ;;  %p350_p12 = scmp.lt.s32.totalorder %s344_s17, %s344_s17 }
  0x23   :  { %277 = vmatpush3.msra.mxu0 %v56_v6 }
  0x24   :  { %278 = vmatprep.subr.mxu0 %v374_v0  ;;  %p351_p13 = por %p350_p12, %p349_p11 }
  0x25   :  { %279 = vmatpush3.msra.mxu0 %v55_v7 }
  0x26   :  { %281 = vmatmul.mubr.msk.f32.vlgmr.msra.gmra.mxu0 %vm60_vm2, %v50_v8  ;;  %p352_p0 = pnand %p351_p13, %p345_p10 }
  0xe2   :  { %v204_v9 = vpop.f32.mrf.mxu1 }
  0xe4   :  { %v289_v10 = vpop.f32.mrf.mxu1 }
  0xe6   :  { %v130_v12 = vpop.f32.mrf.mxu0 }
  0xe7   :  { %v205_v13 = vadd.f32 %v204_v9, %v130_v12 }
  0xe8   :  { %v282_v14 = vpop.f32.mrf.mxu0 }
  0xe9   :  { %v208_v15 = vadd.f32 %v205_v13, %v59_v11 }
  0xeb   :  { %300 = vtanh.f32 %v208_v15 }
  0xf8   :  { %v301_v16 = vpop.eup %300 }
  0xf9   :  { %218 = vrot.lane.b32.xlu0 %v301_v16, %s376_s3  ;;  %v210_v18 = vmul.f32 0.5, %v301_v16 }
  0xfb   :  { %v211_v19 = vadd.f32 0.5, %v210_v18 }
  0xfd   :  { %213 = vrot.lane.b32.xlu0 %v52_v17, %s377_s14 }
 0x16b   :  { %v219_v20 = vpop.permute.xlu0 %218 }
 0x16c   :  { %v221_v21 = vmul.f32 %v219_v20, %v211_v19 }
 0x16e   :  { %223 = vrot.lane.b32.xlu1 %v221_v21, %s377_s14 }
 0x16f   :  { %v214_v22 = vpop.permute.xlu0 %213 }
 0x170   :  { %v216_v23 = vmul.f32 %v214_v22, %v211_v19 }
 0x1e0   :  { %v224_v24 = vpop.permute.xlu1 %223 }
 0x1e1   :  { %v226_v25 = vadd.f32 %v224_v24, %v216_v23 }
 0x1e3   :  { %302 = vtanh.f32 %v226_v25 }
 0x1f0   :  { %v303_v26 = vpop.eup %302 }
 0x1f1   :  { %229 = vrot.lane.b32.xlu1 %v303_v26, %s376_s3 }
 0x1f5   :  { %239 = vrot.lane.b32.xlu1 %v226_v25, %s378_s4 }
 0x263   :  { %v230_v27 = vpop.permute.xlu1 %229 }
 0x264   :  { %v232_v28 = vmul.f32 %v230_v27, %v211_v19 }
 0x266   :  { %234 = vrot.lane.b32.xlu0 %v232_v28, %s377_s14 }
 0x267   :  { %v240_v29 = vpop.permute.xlu1 %239 }
 0x268   :  { %243 = vst.msk [vmem:[#allocation7 + $0x8] sm:$0xff] %vm60_vm2, %v240_v29 }
 0x2d8   :  { %v235_v30 = vpop.permute.xlu0 %234 }
 0x2d9   :  { %237 = vst.msk [vmem:[#allocation7] sm:$0xff] %vm60_vm2, %v235_v30 }
 0x2da   :  { %355 = shalt.err (!%p352_p0)
}
 0x2db   :  { %255 = dma.vmem_to_hbm [thread:$0]  %s250_s16, 256, %s454_s5, [#allocation4], %s371_s21, %s371_s21, %s372_s22  }
 0x2dc   :  { %368 = dma.done.wait [#allocation4], 256  }
 0x2dd   :  { %369 = vsyncadd [#allocation4], 4294967040 }
 0x2de   :  { %259 = vsyncpa [#allocation3], 1 }
 0x2df   :  { %260 = vsyncpa [#allocation6], 1 }
 0x2e0   :  { %261 = vsyncpa [#allocation4], 1 }

</bundles_post_ra>
